<compile_context>
chip_gen: v5e
topology: v5e:2x2
jax: 0.10.0
libtpu: 0.0.40
codegen_flags: <defaults>
</compile_context>

<pallas_src>
import math
import functools
import numpy as np
import jax
import jax.numpy as jnp
from jax import lax
from jax.experimental import pallas as pl
from jax.experimental.pallas import tpu as pltpu

_MASK_LANES = 128                      # lane-dense query-mask width (one vreg row)


# ---------------------------------------------------------------- device config / tiling helpers
def _device_config():
    """Per-generation matmul/attention tile targets and VMEM caps."""
    try:
        kind = jax.devices()[0].device_kind.lower()
    except Exception:
        kind = ""
    if "v5 lite" in kind or "v5lite" in kind or "v5e" in kind:
        # v5e: 4x(128x128) MXU, single vector-store slot, 128 MiB VMEM
        return dict(tm=512, tn=256, tk=1024, tq=512, tkv=128, vmem=80 * 2**20)
    if "v7" in kind:
        # v7x: 2x(256x256) MXU, 64 MiB VMEM per TensorCore, 2 TCs
        return dict(tm=512, tn=256, tk=1024, tq=512, tkv=256, vmem=48 * 2**20)
    # v6e / default: 2x(256x256) MXU, 128 MiB VMEM
    return dict(tm=512, tn=512, tk=1024, tq=512, tkv=256, vmem=96 * 2**20)


def _fit_tile(dim, target, align):
    """Largest tile <= target that divides dim and is a multiple of `align`;
    falls back to the full dim (always a legal block) when dim is small/odd."""
    if dim <= target:
        return dim
    t = (target // align) * align
    while t >= align:
        if dim % t == 0:
            return t
        t -= align
    return dim


def _legal_tiles(dim, align):
    """Legal block sizes for `dim` (descending): aligned divisors plus the full dim."""
    ts = {dim}
    t = align
    while t < dim:
        if dim % t == 0:
            ts.add(t)
        t += align
    return sorted(ts, reverse=True)


# ---------------------------------------------------------------- grouped tiled linear (QKV / FF1)
def _grouped_linear_kernel(x_ref, w_ref, b_ref, o_ref, acc_ref, *, relu):
    @pl.when(pl.program_id(3) == 0)
    def _init():
        acc_ref[...] = jnp.zeros(acc_ref.shape, acc_ref.dtype)

    # bf16 MXU inputs, f32 accumulation (w arrives as bf16 from HBM).
    acc_ref[...] += jnp.dot(x_ref[...].astype(jnp.bfloat16), w_ref[0],
                            preferred_element_type=jnp.float32)

    @pl.when(pl.program_id(3) == pl.num_programs(3) - 1)
    def _finish():
        y = acc_ref[...] + b_ref[0]          # bias only once, in the finalize
        if relu:
            y = jnp.maximum(y, 0.0)
        o_ref[0] = y.astype(o_ref.dtype)


def grouped_linear(x, w, b, relu=False, out_dtype=jnp.bfloat16):
    """x:(M,K) @ w:(G,K,N) + b:(G,1,N) -> (G,M,N).  G=3 fuses Q/K/V into one pass
    over x; G=1 is a plain tiled linear (FF1, with fused ReLU).  Grid ordered
    (M, N, G, K) so the outermost parallel axis is the even M-block axis
    (v7x megacore friendliness); K is the innermost reduction axis."""
    M, K = x.shape
    G, _, N = w.shape
    cfg = _device_config()
    tm = _fit_tile(M, cfg["tm"], 8)
    tn = _fit_tile(N, cfg["tn"], 128)
    tk = _fit_tile(K, cfg["tk"], 128)
    w_bf = w.astype(jnp.bfloat16)               # halves weight DMA bytes
    grid = (M // tm, N // tn, G, K // tk)
    cost = pl.CostEstimate(
        flops=int(2 * G * M * N * K),
        transcendentals=0,
        bytes_accessed=int(M * K * x.dtype.itemsize + G * K * N * 2
                           + G * M * N * np.dtype(out_dtype).itemsize))
    # TODO(synk): v7x-only option — fp8 weights-only quantization of w_bf.
    return pl.pallas_call(
        functools.partial(_grouped_linear_kernel, relu=relu),
        out_shape=jax.ShapeDtypeStruct((G, M, N), out_dtype),
        grid=grid,
        in_specs=[
            pl.BlockSpec((tm, tk), lambda i, j, g, k: (i, k)),
            pl.BlockSpec((1, tk, tn), lambda i, j, g, k: (g, k, j)),
            pl.BlockSpec((1, 1, tn), lambda i, j, g, k: (g, 0, j)),
        ],
        out_specs=pl.BlockSpec((1, tm, tn), lambda i, j, g, k: (g, i, j)),
        scratch_shapes=[pltpu.VMEM((tm, tn), jnp.float32)],
        compiler_params=pltpu.CompilerParams(
            dimension_semantics=("parallel", "parallel", "parallel", "arbitrary"),
            vmem_limit_bytes=cfg["vmem"]),
        cost_estimate=cost,
    )(x, w_bf, b)


# ---------------------------------------------------------------- linear + residual + norm (fused epilogue)
def _linear_residual_norm_kernel(x_ref, w_ref, b_ref, r_ref, a_ref, g_ref,
                                 o_ref, acc_ref, *, eps, denom):
    @pl.when(pl.program_id(1) == 0)
    def _init():
        acc_ref[...] = jnp.zeros(acc_ref.shape, acc_ref.dtype)

    acc_ref[...] += jnp.dot(x_ref[...].astype(jnp.bfloat16), w_ref[...],
                            preferred_element_type=jnp.float32)

    @pl.when(pl.program_id(1) == pl.num_programs(1) - 1)
    def _finish():
        # TODO(synk): residual dropout implemented as eval-mode identity.
        z = acc_ref[...] + b_ref[...] + r_ref[...]
        mean = jnp.mean(z, axis=-1, keepdims=True)
        c = z - mean
        # torch.std uses Bessel's correction (ddof=1): denom = D - 1
        std = jnp.sqrt(jnp.sum(c * c, axis=-1, keepdims=True) / denom)
        inv = pl.reciprocal(std + eps)           # EUP reciprocal + VPU multiply
        o_ref[...] = a_ref[...] * c * inv + g_ref[...]


def _lrn_tiles(M, K, N, x_itemsize, cfg):
    """VMEM-budget-gated (tm, tk) for the full-N-output matmul+norm kernel."""
    budget = int(cfg["vmem"] * 0.7)

    def usage(tm, tk):
        return (2 * (tm * tk * x_itemsize        # x block (double-buffered)
                     + tk * N * 2                # bf16 weight block
                     + tm * N * 4                # residual block
                     + tm * N * 4                # output block
                     + 3 * N * 4)                # bias / alpha / beta
                + tm * N * 4)                    # f32 accumulator scratch

    tms = [t for t in _legal_tiles(M, 8) if t <= cfg["tm"]] or [min(_legal_tiles(M, 8))]
    tks = [t for t in _legal_tiles(K, 128) if t <= cfg["tk"]] or [min(_legal_tiles(K, 128))]
    for tm in tms:
        for tk in tks:
            if usage(tm, tk) <= budget:
                return tm, tk
    return tms[-1], tks[-1]


def linear_residual_norm(x, w, b, residual, alpha, beta, eps=1e-6):
    """Norm(residual + (x @ w + b)): matmul accumulates over k, epilogue does
    bias + residual-add + LayerNorm.  Output width is full d_model so the norm
    sees whole rows while they are still resident in VMEM; tile sizes are gated
    on the per-generation VMEM budget (v7x: 64 MiB physical)."""
    M, K = x.shape
    _, N = w.shape
    cfg = _device_config()
    tm, tk = _lrn_tiles(M, K, N, x.dtype.itemsize, cfg)
    w_bf = w.astype(jnp.bfloat16)
    grid = (M // tm, K // tk)
    cost = pl.CostEstimate(
        flops=int(2 * M * K * N + 10 * M * N),
        transcendentals=int(2 * M),
        bytes_accessed=int(M * K * x.dtype.itemsize + K * N * 2 + 3 * M * N * 4))
    return pl.pallas_call(
        functools.partial(_linear_residual_norm_kernel, eps=eps, denom=float(N - 1)),
        out_shape=jax.ShapeDtypeStruct((M, N), jnp.float32),
        grid=grid,
        in_specs=[
            pl.BlockSpec((tm, tk), lambda i, k: (i, k)),
            pl.BlockSpec((tk, N), lambda i, k: (k, 0)),
            pl.BlockSpec((1, N), lambda i, k: (0, 0)),
            pl.BlockSpec((tm, N), lambda i, k: (i, 0)),
            pl.BlockSpec((1, N), lambda i, k: (0, 0)),
            pl.BlockSpec((1, N), lambda i, k: (0, 0)),
        ],
        out_specs=pl.BlockSpec((tm, N), lambda i, k: (i, 0)),
        scratch_shapes=[pltpu.VMEM((tm, N), jnp.float32)],
        compiler_params=pltpu.CompilerParams(
            dimension_semantics=("parallel", "arbitrary"),
            vmem_limit_bytes=cfg["vmem"]),
        cost_estimate=cost,
    )(x, w_bf, b, residual, alpha, beta)


# ---------------------------------------------------------------- attention (flash-style, heads in-kernel)
def _attention_kernel(q_ref, k_ref, v_ref, m_ref, o_ref, m_sc, l_sc, acc_sc,
                      *, heads, d_k):
    ki = pl.program_id(2)

    @pl.when(ki == 0)
    def _init():
        m_sc[...] = jnp.full(m_sc.shape, -1e30, jnp.float32)
        l_sc[...] = jnp.zeros(l_sc.shape, jnp.float32)
        acc_sc[...] = jnp.zeros(acc_sc.shape, jnp.float32)

    q = q_ref[0, 0]                       # (tq, D) bf16
    k = k_ref[0, 0]                       # (tkv, D) bf16
    v = v_ref[0, 0]                       # (tkv, D) bf16
    # lane-dense bf16 mask block; column 0 carries the per-QUERY-row keep flag
    pad_q = m_ref[0][:, :1] == 0          # (tq, 1)

    # TODO(synk): when d_k < 128, per-head lane slices below cause XLU relayouts;
    # packing heads into 128-lane groups is a further optimization not applied here.
    for h in range(heads):                # static unroll; per-head column slices
        sl = slice(h * d_k, (h + 1) * d_k)
        # unscaled scores (no 1/sqrt(d_k)); bf16 inputs, f32 accumulation;
        # contracting last axes (no in-kernel k.T)
        s = lax.dot_general(q[:, sl], k[:, sl],
                            dimension_numbers=(((1,), (1,)), ((), ())),
                            preferred_element_type=jnp.float32)      # (tq, tkv) f32
        # masked_fill on query rows, exactly like mask.unsqueeze(1).unsqueeze(3)
        s = jnp.where(pad_q, -1e9, s)
        m_prev = m_sc[h]                                             # (tq, 1)
        m_new = jnp.maximum(m_prev, jnp.max(s, axis=-1, keepdims=True))
        a = jnp.exp(m_prev - m_new)
        p = jnp.exp(s - m_new)
        # TODO(synk): dropout on attention probs implemented as eval-mode identity.
        l_sc[h] = a * l_sc[h] + jnp.sum(p, axis=-1, keepdims=True)
        acc_sc[h] = a * acc_sc[h] + jnp.dot(p.astype(jnp.bfloat16), v[:, sl],
                                            preferred_element_type=jnp.float32)
        m_sc[h] = m_new

    @pl.when(ki == pl.num_programs(2) - 1)
    def _finish():
        # single lane-dense store in concat (B, S, H*d_k) layout
        outs = [acc_sc[h] * pl.reciprocal(l_sc[h]) for h in range(heads)]
        o_ref[0] = jnp.concatenate(outs, axis=-1).astype(o_ref.dtype)


def attention(qkv, mask_lane, heads):
    """qkv: (3, B, S, D) bf16 packed projections (q=0, k=1, v=2);
    mask_lane: (B, S, 128) bf16.  Online-softmax over kv blocks; output already
    in concat layout (bf16) -> no transposes."""
    _, B, S, D = qkv.shape
    d_k = D // heads
    cfg = _device_config()
    tq = _fit_tile(S, cfg["tq"], 8)
    tkv = _fit_tile(S, cfg["tkv"], 128)
    grid = (B, S // tq, S // tkv)
    blk_q = pl.BlockSpec((1, 1, tq, D), lambda b, qi, ki: (0, b, qi, 0))
    blk_k = pl.BlockSpec((1, 1, tkv, D), lambda b, qi, ki: (1, b, ki, 0))
    blk_v = pl.BlockSpec((1, 1, tkv, D), lambda b, qi, ki: (2, b, ki, 0))
    blk_m = pl.BlockSpec((1, tq, _MASK_LANES), lambda b, qi, ki: (b, qi, 0))
    cost = pl.CostEstimate(
        flops=int(4 * B * S * S * D),
        transcendentals=int(B * heads * S * S),
        bytes_accessed=int(3 * B * S * D * 2 + B * S * D * 2 + B * S * _MASK_LANES * 2))
    return pl.pallas_call(
        functools.partial(_attention_kernel, heads=heads, d_k=d_k),
        out_shape=jax.ShapeDtypeStruct((B, S, D), jnp.bfloat16),
        grid=grid,
        in_specs=[blk_q, blk_k, blk_v, blk_m],
        out_specs=pl.BlockSpec((1, tq, D), lambda b, qi, ki: (b, qi, 0)),
        scratch_shapes=[pltpu.VMEM((heads, tq, 1), jnp.float32),    # running max
                        pltpu.VMEM((heads, tq, 1), jnp.float32),    # running sum
                        pltpu.VMEM((heads, tq, d_k), jnp.float32)],  # running acc
        compiler_params=pltpu.CompilerParams(
            dimension_semantics=("parallel", "parallel", "arbitrary"),
            vmem_limit_bytes=cfg["vmem"]),
        cost_estimate=cost,
    )(qkv, qkv, qkv, mask_lane)


# ---------------------------------------------------------------- final norm
def _norm_kernel(x_ref, a_ref, b_ref, o_ref, *, eps, denom):
    z = x_ref[...]
    mean = jnp.mean(z, axis=-1, keepdims=True)
    c = z - mean
    std = jnp.sqrt(jnp.sum(c * c, axis=-1, keepdims=True) / denom)
    inv = pl.reciprocal(std + eps)
    o_ref[...] = a_ref[...] * c * inv + b_ref[...]


def layer_norm(x, alpha, beta, eps=1e-6):
    """Norm-only kernel for the final self.norm (no zeros residual tensor)."""
    M, D = x.shape
    cfg = _device_config()
    tm = _fit_tile(M, 512, 8)
    return pl.pallas_call(
        functools.partial(_norm_kernel, eps=eps, denom=float(D - 1)),
        out_shape=jax.ShapeDtypeStruct((M, D), jnp.float32),
        grid=(M // tm,),
        in_specs=[pl.BlockSpec((tm, D), lambda i: (i, 0)),
                  pl.BlockSpec((1, D), lambda i: (0, 0)),
                  pl.BlockSpec((1, D), lambda i: (0, 0))],
        out_specs=pl.BlockSpec((tm, D), lambda i: (i, 0)),
        compiler_params=pltpu.CompilerParams(dimension_semantics=("parallel",),
                                             vmem_limit_bytes=cfg["vmem"]),
    )(x, alpha, beta)


# ---------------------------------------------------------------- parameters
def make_pe_table(max_seq_len, d_model):
    pe = np.zeros((max_seq_len, d_model), dtype=np.float64)
    for pos in range(max_seq_len):
        for i in range(0, d_model, 2):
            pe[pos, i] = np.sin(pos / 10000 ** (2 * i / d_model))
            pe[pos, i + 1] = np.cos(pos / 10000 ** (2 * (i + 1) / d_model))
    return jnp.asarray(pe, dtype=jnp.float32)


def init_params(key, vocab_size, seq_len, d_model, heads, layers, d_ff=2048):
    keys = jax.random.split(key, 1 + layers)
    emb = jax.random.normal(keys[0], (vocab_size, d_model), jnp.float32)

    def lin(k, d_in, d_out):
        kw, kb = jax.random.split(k)
        w = jax.random.normal(kw, (d_in, d_out), jnp.float32) * (1.0 / math.sqrt(d_in))
        b = jax.random.normal(kb, (d_out,), jnp.float32) * 0.01
        return w, b

    layer_params = []
    for li in range(layers):
        lk = jax.random.split(keys[1 + li], 6)
        qw, qb = lin(lk[0], d_model, d_model)
        kw_, kb_ = lin(lk[1], d_model, d_model)
        vw, vb = lin(lk[2], d_model, d_model)
        ow, ob = lin(lk[3], d_model, d_model)
        f1w, f1b = lin(lk[4], d_model, d_ff)
        f2w, f2b = lin(lk[5], d_ff, d_model)
        layer_params.append(dict(
            qkv_w=jnp.stack([qw, kw_, vw]),               # (3, D, D) fused QKV
            qkv_b=jnp.stack([qb, kb_, vb])[:, None, :],   # (3, 1, D)
            o_w=ow, o_b=ob.reshape(1, d_model),
            ff1_w=f1w[None], ff1_b=f1b.reshape(1, 1, d_ff),
            ff2_w=f2w, ff2_b=f2b.reshape(1, d_model),
            n1_a=jnp.ones((1, d_model), jnp.float32), n1_b=jnp.zeros((1, d_model), jnp.float32),
            n2_a=jnp.ones((1, d_model), jnp.float32), n2_b=jnp.zeros((1, d_model), jnp.float32)))
    return dict(emb=emb, pe=make_pe_table(seq_len, d_model), layers=layer_params,
                norm_a=jnp.ones((1, d_model), jnp.float32),
                norm_b=jnp.zeros((1, d_model), jnp.float32),
                heads=heads)


# ---------------------------------------------------------------- forward
def transformer_forward(ids, mask, params):
    B, S = ids.shape
    D = params["emb"].shape[1]
    H = params["heads"]
    M = B * S

    # TODO(synk): embedding gather left to XLA (data-dependent row gather).
    # Positional scale+add fused here in plain JAX so XLA fuses it with the gather
    # (no extra (B,S,D) HBM round-trip for a standalone elementwise kernel).
    x2 = (params["emb"][ids] * math.sqrt(D) + params["pe"]).reshape(M, D)   # f32

    # lane-dense bf16 query-row mask (full-width vector loads inside attention)
    mask_lane = jnp.broadcast_to(
        mask.astype(jnp.bfloat16)[:, :, None], (B, S, _MASK_LANES))

    for lp in params["layers"]:
        qkv = grouped_linear(x2, lp["qkv_w"], lp["qkv_b"])               # (3, M, D) bf16
        attn = attention(qkv.reshape(3, B, S, D), mask_lane, heads=H)    # (B, S, D) bf16 concat
        # norm_1(x + out_proj(attn))  -- residual add + LayerNorm fused in epilogue
        x2 = linear_residual_norm(attn.reshape(M, D), lp["o_w"], lp["o_b"],
                                  x2, lp["n1_a"], lp["n1_b"])            # (M, D) f32
        # TODO(synk): FF inner dropout implemented as eval-mode identity.
        h = grouped_linear(x2, lp["ff1_w"], lp["ff1_b"], relu=True)[0]   # (M, d_ff) bf16
        # norm_2(x + ff2(h))
        x2 = linear_residual_norm(h, lp["ff2_w"], lp["ff2_b"],
                                  x2, lp["n2_a"], lp["n2_b"])

    return layer_norm(x2, params["norm_a"], params["norm_b"]).reshape(B, S, D)


# ---------------------------------------------------------------- pure-JAX reference (matching bf16 cast points)
def reference_forward(ids, mask, params):
    B, S = ids.shape
    D = params["emb"].shape[1]
    H = params["heads"]
    Dk = D // H
    M = B * S
    bf = jnp.bfloat16

    def c(a):  # emulate bf16 MXU inputs with f32 accumulation
        return a.astype(bf).astype(jnp.float32)

    def norm(z, a, b, eps=1e-6):
        mean = z.mean(-1, keepdims=True)
        cz = z - mean
        std = jnp.sqrt((cz * cz).sum(-1, keepdims=True) / (D - 1))
        return a * cz / (std + eps) + b

    x = params["emb"][ids] * math.sqrt(D) + params["pe"]
    m = mask.astype(jnp.float32)[:, None, :, None]           # (B,1,S,1): query-row mask
    for lp in params["layers"]:
        x2 = x.reshape(M, D)
        qkv = jnp.stack([c(x2) @ c(lp["qkv_w"][g]) for g in range(3)]) + lp["qkv_b"]
        qkv = qkv.astype(bf)                                  # kernel stores QKV in bf16
        q, k, v = [t.reshape(B, S, H, Dk).transpose(0, 2, 1, 3) for t in qkv]
        s = jnp.einsum("bhqd,bhkd->bhqk",
                       q.astype(jnp.float32), k.astype(jnp.float32))     # unscaled
        s = jnp.where(m == 0.0, -1e9, s)
        p = jax.nn.softmax(s, axis=-1)
        a = jnp.einsum("bhqk,bhkd->bhqd", c(p), v.astype(jnp.float32))
        concat = a.transpose(0, 2, 1, 3).reshape(M, D).astype(bf)        # kernel stores bf16
        attn_out = (c(concat.astype(jnp.float32)) @ c(lp["o_w"]) + lp["o_b"]).reshape(B, S, D)
        x = norm(x + attn_out, lp["n1_a"], lp["n1_b"])
        h = jnp.maximum(c(x.reshape(M, D)) @ c(lp["ff1_w"][0]) + lp["ff1_b"][0], 0.0)
        h = h.astype(bf)                                      # kernel stores FF1 in bf16
        ff = (c(h.astype(jnp.float32)) @ c(lp["ff2_w"]) + lp["ff2_b"]).reshape(B, S, D)
        x = norm(x + ff, lp["n2_a"], lp["n2_b"])
    return norm(x, params["norm_a"], params["norm_b"])


if __name__ == "__main__":
    vocab_size, seq_len, d_model, heads, layers = 50, 8, 32, 4, 2
    batch = 2

    key = jax.random.PRNGKey(0)
    k_ids, k_params = jax.random.split(key)
    params = init_params(k_params, vocab_size, seq_len, d_model, heads, layers)

    ids = jax.random.randint(k_ids, (batch, seq_len), 0, vocab_size, dtype=jnp.int32)
    mask = jnp.ones((batch, seq_len), dtype=jnp.int32).at[0, -2:].set(0)

    out = jax.block_until_ready(transformer_forward(ids, mask, params))
    ref = jax.block_until_ready(reference_forward(ids, mask, params))
    assert out.shape == (batch, seq_len, d_model)
    # Tolerance relaxed from 1e-4: matmul inputs are bf16 on the MXU (review item 1);
    # the reference applies the same cast points, residual error comes from the
    # flash-style unnormalized-p bf16 rounding and accumulation-order differences.
    np.testing.assert_allclose(np.asarray(out), np.asarray(ref), rtol=2e-2, atol=2e-2)

    print("KERNEL_OK")
</pallas_src>

<mosaic_0001>
module attributes {stable_mosaic.version = 11 : i64} {
  func.func @_grouped_linear_kernel(%arg0: i32, %arg1: i32, %arg2: i32, %arg3: i32, %arg4: memref<16x32xf32, #tpu.memory_space<vmem>>, %arg5: memref<1x32x32xbf16, #tpu.memory_space<vmem>>, %arg6: memref<1x1x32xf32, #tpu.memory_space<vmem>>, %arg7: memref<1x16x32xbf16, #tpu.memory_space<vmem>>, %arg8: memref<16x32xf32, #tpu.memory_space<vmem>>) attributes {dimension_semantics = [#tpu.dimension_semantics<parallel>, #tpu.dimension_semantics<parallel>, #tpu.dimension_semantics<parallel>, #tpu.dimension_semantics<arbitrary>], iteration_bounds = array<i64: 1, 1, 3, 1>, scalar_prefetch = 0 : i64, scratch_operands = 1 : i64, tpu.core_type = #tpu.core_type<tc>, window_params = [{transform_indices = @transform_0, window_bounds = array<i64: 16, 32>}, {transform_indices = @transform_1, window_bounds = array<i64: 1, 32, 32>}, {transform_indices = @transform_2, window_bounds = array<i64: 1, 1, 32>}, {transform_indices = @transform_3, window_bounds = array<i64: 1, 16, 32>}]} {
    %c0_i32 = arith.constant 0 : i32
    %0 = arith.cmpi eq, %arg3, %c0_i32 : i32
    %1 = arith.extui %0 : i1 to i32
    %c0_i32_0 = arith.constant 0 : i32
    %2 = arith.cmpi ne, %1, %c0_i32_0 : i32
    scf.if %2 {
      %cst_11 = arith.constant 0.000000e+00 : f32
      %14 = vector.broadcast %cst_11 : f32 to vector<16x32xf32>
      %c0_12 = arith.constant 0 : index
      %c0_13 = arith.constant 0 : index
      %15 = vector.load %arg8[%c0_12, %c0_13] : memref<16x32xf32, #tpu.memory_space<vmem>>, vector<16x32xf32>
      tpu.vector_store %arg8[%c0_12, %c0_13], %14 {strides = array<i32>} : memref<16x32xf32, #tpu.memory_space<vmem>>, vector<16x32xf32>,
    } else {
    }
    %c0 = arith.constant 0 : index
    %c0_1 = arith.constant 0 : index
    %3 = vector.load %arg8[%c0, %c0_1] : memref<16x32xf32, #tpu.memory_space<vmem>>, vector<16x32xf32>
    %c0_2 = arith.constant 0 : index
    %c0_3 = arith.constant 0 : index
    %4 = vector.load %arg4[%c0_2, %c0_3] : memref<16x32xf32, #tpu.memory_space<vmem>>, vector<16x32xf32>
    %5 = arith.truncf %4 : vector<16x32xf32> to vector<16x32xbf16>
    %c0_4 = arith.constant 0 : index
    %c0_5 = arith.constant 0 : index
    %c0_6 = arith.constant 0 : index
    %6 = vector.load %arg5[%c0_4, %c0_5, %c0_6] : memref<1x32x32xbf16, #tpu.memory_space<vmem>>, vector<1x32x32xbf16>
    %7 = vector.shape_cast %6 : vector<1x32x32xbf16> to vector<32x32xbf16>
    %cst = arith.constant dense<0.000000e+00> : vector<16x32xf32>
    %8 = tpu.matmul %5, %7, %cst {dimension_numbers = #tpu.dot_dimension_numbers<[1], [0], [0], [1], [0, 0, 1, 1], [], []>} : vector<16x32xbf16>, vector<32x32xbf16>, vector<16x32xf32> -> vector<16x32xf32>
    %9 = arith.addf %3, %8 : vector<16x32xf32>
    %c0_7 = arith.constant 0 : index
    %c0_8 = arith.constant 0 : index
    %10 = vector.load %arg8[%c0_7, %c0_8] : memref<16x32xf32, #tpu.memory_space<vmem>>, vector<16x32xf32>
    tpu.vector_store %arg8[%c0_7, %c0_8], %9 {strides = array<i32>} : memref<16x32xf32, #tpu.memory_space<vmem>>, vector<16x32xf32>,
    %c0_i32_9 = arith.constant 0 : i32
    %11 = arith.cmpi eq, %arg3, %c0_i32_9 : i32
    %12 = arith.extui %11 : i1 to i32
    %c0_i32_10 = arith.constant 0 : i32
    %13 = arith.cmpi ne, %12, %c0_i32_10 : i32
    scf.if %13 {
      %c0_11 = arith.constant 0 : index
      %c0_12 = arith.constant 0 : index
      %14 = vector.load %arg8[%c0_11, %c0_12] : memref<16x32xf32, #tpu.memory_space<vmem>>, vector<16x32xf32>
      %c0_13 = arith.constant 0 : index
      %c0_14 = arith.constant 0 : index
      %c0_15 = arith.constant 0 : index
      %15 = vector.load %arg6[%c0_13, %c0_14, %c0_15] : memref<1x1x32xf32, #tpu.memory_space<vmem>>, vector<1x1x32xf32>
      %16 = vector.shape_cast %15 : vector<1x1x32xf32> to vector<1x32xf32>
      %17 = vector.broadcast %16 : vector<1x32xf32> to vector<16x32xf32>
      %18 = arith.addf %14, %17 : vector<16x32xf32>
      %19 = arith.truncf %18 : vector<16x32xf32> to vector<16x32xbf16>
      %c0_16 = arith.constant 0 : index
      %c0_17 = arith.constant 0 : index
      %c0_18 = arith.constant 0 : index
      %20 = vector.load %arg7[%c0_16, %c0_17, %c0_18] : memref<1x16x32xbf16, #tpu.memory_space<vmem>>, vector<1x16x32xbf16>
      %21 = vector.shape_cast %20 : vector<1x16x32xbf16> to vector<16x32xbf16>
      %22 = vector.shape_cast %19 : vector<16x32xbf16> to vector<1x16x32xbf16>
      tpu.vector_store %arg7[%c0_16, %c0_17, %c0_18], %22 {strides = array<i32>} : memref<1x16x32xbf16, #tpu.memory_space<vmem>>, vector<1x16x32xbf16>,
    } else {
    }
    return
  }
  func.func @transform_0(%arg0: i32, %arg1: i32, %arg2: i32, %arg3: i32) -> (i32, i32) {
    %c0_i32 = arith.constant 0 : i32
    return %arg0, %arg3 : i32, i32
  }
  func.func @transform_1(%arg0: i32, %arg1: i32, %arg2: i32, %arg3: i32) -> (i32, i32, i32) {
    %c0_i32 = arith.constant 0 : i32
    return %arg2, %arg3, %arg1 : i32, i32, i32
  }
  func.func @transform_2(%arg0: i32, %arg1: i32, %arg2: i32, %arg3: i32) -> (i32, i32, i32) {
    %c0_i32 = arith.constant 0 : i32
    %c0_i32_0 = arith.constant 0 : i32
    return %arg2, %c0_i32, %arg1 : i32, i32, i32
  }
  func.func @transform_3(%arg0: i32, %arg1: i32, %arg2: i32, %arg3: i32) -> (i32, i32, i32) {
    %c0_i32 = arith.constant 0 : i32
    return %arg2, %arg0, %arg1 : i32, i32, i32
  }
}

</mosaic_0001>

<bundles_post_ra>
// kernel: tpu_custom_call.1
= control target key start
LH: loop header
LB: loop body
LE: loop exit
PB: predicated region body
PF: predicated region fallthrough
CT: control target
= control target key end

     0   :  { %8 = vsyncpa [#allocation4], 0  ;;  %s1007_s0 = inlined_call_operand.hbm [shape: f32[16,32], index: 0, kind: input, shape index: {}]   ;;  %s1008_s1 = inlined_call_operand.hbm [shape: bf16[3,32,32], index: 1, kind: input, shape index: {}]   ;;  %s1009_s2 = inlined_call_operand.hbm [shape: f32[3,1,32], index: 2, kind: input, shape index: {}]   ;;  %s1010_s3 = inlined_call_operand.hbm [shape: bf16[3,16,32], index: 3, kind: output, shape index: {}]  }
   0x1   :  { %9 = vsyncpa [#allocation7], 0 }
   0x2   :  { %11 = vsyncpa [#allocation7 + $0x1], 0 }
   0x3   :  { %12 = vsyncpa [#allocation5], 0 }
   0x4   :  { %14 = vsyncpa [#allocation5 + $0x1], 0  ;;  %s830_s12 = smov 0   ;;  %s832_s13 = smov 0  }
   0x5   :  { %s834_s14 = smov 0   ;;  %s836_s15 = smov 0  }
   0x6   :  { %s838_s16 = smov 0   ;;  %s840_s17 = smov 0  }
   0x7 LB: > { %s38_s18 = sadd.s32 1, %s796_s16  ;;  %s85_s19 = sadd.s32 1, %s788_s14  ;;  %s800_s17 = sphi %s840_s17, %s20_s17   ;;  %s796_s16 = sphi %s838_s16, %s1021_s16   ;;  %s792_s15 = sphi %s836_s15, %s1020_s15   ;;  %s788_s14 = sphi %s834_s14, %s1019_s14   ;;  %s784_s13 = sphi %s832_s13, %s1018_s13   ;;  %s780_s12 = sphi %s830_s12, %s1017_s12  }
   0x8   : > { %p40_p0 = scmp.ge.s32.totalorder %s38_s18, 3  ;;  %p92_p1 = scmp.ne.s32.totalorder %s788_s14, %s784_s13 }
   0x9   : > { %p93_p2 = scmp.eq.s32.totalorder %s800_s17, 0  ;;  %p564_p4 = scmp.lt.s32.totalorder %s800_s17, 3 }
   0xa   : > { %s1023_s18 = smov (%p40_p0, %s38_s18), 0  ;;  %s198_s22 = sand.u32 1, %s800_s17  }
   0xb   : > { %p870_p3 = por %p93_p2, %p92_p1  ;;  %s78_s21 = ssub.s32 %s796_s16, %s1023_s18 }
   0xc   : > { %p83_p5 = scmp.eq.s32.totalorder %s78_s21, 0  ;;  %s200_s23 = sand.u32 1, %s788_s14  }
   0xd   : > { %s534_s24 = sshll.u32 %s796_s16, 4  ;;  %s513_s26 = sshll.u32 %s200_s23, 4 }
   0xe   : > { %s881_s25 = scalar_select %p83_p5, %s788_s14, %s85_s19  }
   0xf   : > { %s210_s29 = scalar_lea.hbm %s1008_s1, %s534_s24  ;;  %s202_s4 = scalar_lea.vmem [#allocation6], %s513_s26 }
  0x10   : > { %s211_s30 = sshll.u32 %s210_s29, 4  ;;  %s213_s5 = sshll.u32 %s202_s4, 4  ;;  %s212_s30 = int_to_ptr.hbm [resolvable:$true] %s211_s30  ;;  %s214_s5 = int_to_ptr.vmem [resolvable:$true] %s213_s5 }
  0x11   : > { %p892_p6 = pnand %p564_p4, %p870_p3  ;;  %s896_s7 = scalar_lea.sflag [#allocation7], %s198_s22 }
  0x12   : > { %s802_s8 = smov 64   ;;  %s803_s9 = smov 4  }
  0x13   : > { %555 = dma.hbm_to_vmem [thread:$0]  (!%p892_p6), %s212_s30, 256, %s214_s5, %s896_s7, %s802_s8, %s802_s8, %s803_s9  }
  0x14   : > { %s902_s10 = sadd.s32 4294967295, %s800_s17   ;;  %s509_s11 = sadd.s32 4294967294, %s800_s17  }
  0x15   : > { %p98_p7 = scmp.ne.s32.totalorder %s784_s13, %s780_s12  ;;  %p99_p8 = scmp.eq.s32.totalorder %s902_s10, 0 }
  0x16   : > { %p154_p9 = scmp.eq.s32.totalorder %s902_s10, 2  ;;  %p160_p10 = scmp.eq.s32.totalorder %s509_s11, 2 }
  0x17   : > { %p510_p11 = scmp.ge.s32.totalorder %s800_s17, 1  ;;  %p912_p12 = por %p99_p8, %p98_p7 }
  0x18   : > { %p919_p13 = por %p154_p9, %p92_p1  ;;  %p923_p0 = por %p160_p10, %p98_p7 }
  0x19   : > { %p167_p2 = scmp.lt.s32.totalorder %s800_s17, 4  ;;  %s182_s26 = sshll.u32 %s1007_s0, 4  ;;  %s183_s26 = int_to_ptr.hbm [resolvable:$true] %s182_s26 }
  0x1a   : > { %s804_s28 = smov [#allocation3]   ;;  %s230_s5 = scalar_lea.hbm %s1009_s2, %s796_s16 }
  0x1b   : > { %p931_p3 = pnand %p510_p11, %p167_p2  ;;  %s184_s29 = sshll.u32 %s804_s28, 4  ;;  %s185_s29 = int_to_ptr.vmem [resolvable:$true] %s184_s29 }
  0x1c   : > { %s226_s8 = scalar_lea.vmem [#allocation8], %s200_s23  ;;  %s232_s11 = sshll.u32 %s230_s5, 4  ;;  %s233_s11 = int_to_ptr.hbm [resolvable:$true] %s232_s11 }
  0x1d   : > { %p548_p1 = pneg %p931_p3  ;;  %s234_s9 = sshll.u32 %s226_s8, 4  ;;  %s235_s9 = int_to_ptr.vmem [resolvable:$true] %s234_s9 }
  0x1e   : > { %s805_s22 = smov 128   ;;  %s806_s24 = smov 8  }
  0x1f   : > { %p549_p4 = pnand %p548_p1, %p99_p8  ;;  %243 = sbr.rel (%p931_p3) target bundleno = 201 (0xc9), region = 32 }
  0x20   : > { %558 = dma.hbm_to_vmem [thread:$0]  (!%p892_p6), %s233_s11, 16, %s235_s9, %s896_s7  }
  0x21   : > { %551 = dma.hbm_to_vmem [thread:$0]  (!%p549_p4), %s183_s26, 256, %s185_s29, [#allocation4], %s805_s22, %s805_s22, %s806_s24  }
  0x24   : > { %767 = dma.done.wait (%p99_p8), [#allocation4], 256  }
  0x25   : > { %769 = vsyncadd (%p99_p8), [#allocation4], 4294967040  ;;  %s250_s23 = sand.u32 1, %s902_s10   ;;  %s956_s28 = sand.u32 1, %s784_s13  }
  0x26   : > { %s518_s26 = sshll.u32 %s956_s28, 4  ;;  %s251_s29 = scalar_lea.sflag [#allocation7], %s250_s23 }
  0x27   : > { %s254_s6 = scalar_lea.vmem [#allocation6], %s518_s26 }
  0x28   : > { %771 = dma.done.wait (%p912_p12), %s251_s29, 272  }
  0x29   : > { %773 = vsyncadd (%p912_p12), %s251_s29, 4294967024  ;;  %vm299_vm0 = vcmask 261120   ;;  %v807_v0 = vmov 0.0   ;;  %v536_v1 = vld [vmem:[%s254_s6 + $0x8] sm:$0xff]  ;;  %v535_v2 = vld [vmem:[%s254_s6] sm:$0xff]  ;;  %s263_s7 = scalar_lea.vmem [#allocation8], %s956_s28 }
  0x2a   : > { %300 = vst.msk [vmem:[#allocation2] sm:$0xff] %vm299_vm0, %v807_v0  ;;  %333 = vmatpush.bf16.msra.mxu0 %v536_v1  ;;  %v304_v3 = vld [vmem:[#allocation3] sm:$0xff]  ;;  %v305_v4 = vld [vmem:[#allocation3 + $0x8] sm:$0xff]  ;;  %v623_v10 = vld [vmem:[%s263_s7] ss:$0 sm:$0xff]  ;;  %s519_s10 = sshll.u32 %s956_s28, 3 }
  0x2b   : > { %301 = vst.msk [vmem:[#allocation2 + $0x8] sm:$0xff] %vm299_vm0, %v807_v0  ;;  %v306_v5 = vpack.c.bf16 %v305_v4, %v304_v3  ;;  %s537_s19 = sshll.u32 %s792_s15, 3  ;;  %vm358_vm1 = vcmask 257024   ;;  %s290_s5 = scalar_lea.vmem [#allocation9], %s519_s10 }
  0x2c   : > { %s376_s4 = scalar_lea.hbm %s1010_s3, %s537_s19  ;;  %s377_s8 = sshll.u32 %s290_s5, 4  ;;  %s378_s8 = int_to_ptr.vmem [resolvable:$true] %s377_s8 }
  0x2d   : > { %s379_s9 = sshll.u32 %s376_s4, 4  ;;  %s362_s11 = scalar_lea.sflag [#allocation5], %s956_s28  ;;  %s380_s9 = int_to_ptr.hbm [resolvable:$true] %s379_s9 }
  0x2e   : > { %334 = vmatpush.bf16.msra.mxu0 %v535_v2  ;;  %s728_s22 = sshra.s32 %s380_s9, 4  ;;  %s734_s26 = scalar_lea.hbm %s1010_s3, 24  ;;  %s729_s22 = int_to_ptr.hbm [resolvable:$true] %s728_s22 }
  0x2f   : > { %s730_s15 = scalar_lea.hbm %s729_s22, 8  ;;  %p735_p8 = scmp.lt.s32.totalorder %s729_s22, %s1010_s3 }
  0x30   : > { %p731_p5 = scmp.ne.s32.totalorder %s729_s22, %s730_s15  ;;  %p736_p9 = scmp.lt.s32.totalorder %s734_s26, %s730_s15 }
  0x31   : > { %528 = vmatmul.msk.bf16.vlgmr.msra.gmra.mxu0 %vm299_vm0, %v306_v5  ;;  %v302_v6 = vld [vmem:[#allocation2] sm:$0xff] }
  0x32   : > { %v303_v9 = vld [vmem:[#allocation2 + $0x8] sm:$0xff]  ;;  %p732_p6 = pnand %p731_p5, %p919_p13  ;;  %p737_p10 = por %p736_p9, %p735_p8 }
  0x34   : > { %p733_p7 = pneg %p732_p6 }
  0x36   : > { %p738_p11 = pnand %p737_p10, %p733_p7 }
  0xae   : > { %v336_v7 = vpop.f32.mrf.mxu0 }
  0xaf   : > { %v341_v8 = vadd.f32 %v336_v7, %v302_v6 }
  0xb1   : > { %343 = vst.msk [vmem:[#allocation2] sm:$0xff] %vm299_vm0, %v341_v8 }
  0xb6   : > { %v338_v11 = vpop.f32.mrf.mxu0 }
  0xb7   : > { %v342_v12 = vadd.f32 %v338_v11, %v303_v9 }
  0xb8   : > { %v348_v13 = vld [vmem:[#allocation2] sm:$0xff] }
  0xb9   : > { %344 = vst.msk [vmem:[#allocation2 + $0x8] sm:$0xff] %vm299_vm0, %v342_v12  ;;  %v354_v14 = vadd.f32 %v623_v10, %v348_v13 }
  0xbb   : > { %v356_v15 = vpack.c.bf16 %v354_v14, %v354_v14 }
  0xbd   : > { %359 = vst.msk [vmem:[%s290_s5] sm:$0xf] %vm358_vm1, %v356_v15 }
  0xc0   : > { %v349_v16 = vld [vmem:[#allocation2 + $0x8] sm:$0xff] }
  0xc1   : > { %v355_v17 = vadd.f32 %v623_v10, %v349_v16 }
  0xc3   : > { %v357_v18 = vpack.c.bf16 %v355_v17, %v355_v17 }
  0xc5   : > { %360 = vst.msk [vmem:[%s290_s5 + $0x4] sm:$0xf] %vm358_vm1, %v357_v18 }
  0xc6   : > { %741 = shalt.err (!%p738_p11)
}
  0xc7   : > { %s808_s28 = smov 64   ;;  %s809_s7 = smov 4  }
  0xc8   : > { %546 = dma.vmem_to_hbm [thread:$0]  (%p919_p13), %s378_s8, 128, %s380_s9, %s362_s11, %s808_s28, %s808_s28, %s809_s7  }
  0xc9 PF: > { %p566_p12 = scmp.ge.s32.totalorder %s800_s17, 2  ;;  %s394_s10 = sand.u32 1, %s780_s12  }
  0xca   : > { %s395_s19 = scalar_lea.sflag [#allocation5], %s394_s10 }
  0xcb   : > { %p560_p2 = pnand %p566_p12, %p923_p0 }
  0xcd   : > { %p561_p3 = pneg %p560_p2 }
  0xcf   : > { %775 = dma.done.wait (%p561_p3), %s395_s19, 128  }
  0xd0   : > { %777 = vsyncadd (%p561_p3), %s395_s19, 4294967168  ;;  %s20_s17 = sadd.s32 1, %s800_s17   ;;  %s1017_s12 = smov %s784_s13 }
  0xd1   : > { %p17_p1 = scmp.ge.s32.totalorder %s20_s17, 5   ;;  %s1018_s13 = smov %s788_s14 }
  0xd2   : > { %s1019_s14 = smov %s881_s25  ;;  %s1020_s15 = smov %s796_s16 }
  0xd3   : > { %s1021_s16 = smov %s1023_s18  ;;  %19 = sbr.rel (!%p17_p1) target bundleno = 7 (0x7), region = 102 }
  0xd8   :  { %401 = vsyncpa [#allocation4], 1 }
  0xd9   :  { %403 = vsyncpa [#allocation4 + $0x1], 1 }
  0xda   :  { %404 = vsyncpa [#allocation7], 1 }
  0xdb   :  { %406 = vsyncpa [#allocation7 + $0x1], 1 }
  0xdc   :  { %407 = vsyncpa [#allocation5], 1 }
  0xdd   :  { %409 = vsyncpa [#allocation5 + $0x1], 1 }

</bundles_post_ra>
